<compile_context>
chip_gen: v5e
topology: v5e:2x2
jax: 0.10.0
libtpu: 0.0.40
codegen_flags: <defaults>
</compile_context>

<pallas_src>
import functools

import jax
import jax.numpy as jnp
from jax import lax
from jax.experimental import pallas as pl
from jax.experimental.pallas import tpu as pltpu


def _round_up(x: int, m: int) -> int:
    return (x + m - 1) // m * m


def _choose_seq_tile(S: int, E_pad: int, itemsize: int, *, budget_bytes: int,
                     max_ts: int) -> int:
    """Largest TS that divides S, is a multiple of 8 (or == S), is <= max_ts,
    and whose per-step working set (2x out + 2x pos buffers) fits the budget."""
    candidates = sorted(ts for ts in range(1, min(S, max_ts) + 1)
                        if S % ts == 0 and (ts % 8 == 0 or ts == S))
    if not candidates:
        return S  # fall back to whole-sequence blocks
    best = candidates[0]
    for ts in candidates:
        if 4 * ts * E_pad * itemsize <= budget_bytes:
            best = ts
    return best


def _embed_resident_kernel(ids_ref, wtok_ref, wpos_ref, out_ref, *, ts):
    """Small-vocab fast path.

    ids_ref  : SMEM (B*S,) int32          -- scalar-prefetched token ids
    wtok_ref : VMEM (V, E_pad)            -- whole token table, resident
    wpos_ref : VMEM (ts, E_pad)           -- positional rows of this seq tile
    out_ref  : VMEM (ts, E_pad)           -- output block (leading batch dim squeezed)
    """
    b = pl.program_id(0)
    t = pl.program_id(1)
    base = (b * pl.num_programs(1) + t) * ts

    # Gather rows with in-VMEM dynamic loads (ids were clamped in the wrapper).
    rows = [wtok_ref[pl.ds(ids_ref[base + s], 1), :] for s in range(ts)]
    tok = rows[0] if ts == 1 else jnp.concatenate(rows, axis=0)

    # Fused positional add: one VPU pass, lane-dense store.
    out_ref[...] = (tok + wpos_ref[...]).astype(out_ref.dtype)


def _embed_hbm_gather_kernel(ids_ref, wtok_hbm, wpos_ref, out_ref, sems, *,
                             ts, ring):
    """Large-vocab path: per-row DMA gather from HBM straight into the output
    block, with a bounded ring of `ring` in-flight copies.

    ids_ref  : SMEM (B*S,) int32
    wtok_hbm : HBM  (V, E_pad)            -- token table stays in HBM
    wpos_ref : VMEM (ts, E_pad)
    out_ref  : VMEM (ts, E_pad)           -- gather destination AND output block
    sems     : DMA semaphores (ring,)
    """
    b = pl.program_id(0)
    t = pl.program_id(1)
    base = (b * pl.num_programs(1) + t) * ts

    def row_copy(s):
        tok_id = ids_ref[base + s]
        return pltpu.make_async_copy(
            wtok_hbm.at[pl.ds(tok_id, 1), :],
            out_ref.at[pl.ds(s, 1), :],
            sems.at[s % ring])

    # Prime the ring (static loop: `ring` is a small Python int).
    for s in range(ring):
        row_copy(s).start()

    # Wait in issue order; keep `ring` row DMAs in flight.
    def wait_then_refill(s, carry):
        row_copy(s).wait()

        @pl.when(s + ring < ts)
        def _():
            row_copy(s + ring).start()

        return carry

    lax.fori_loop(0, ts, wait_then_refill, 0)

    # Fused positional add, in place on the gathered rows.
    out_ref[...] = (out_ref[...] + wpos_ref[...]).astype(out_ref.dtype)


def embed_forward(x, w_tok, w_pos, dropout: float = 0.0, *,
                  resident_table_budget_bytes: int = 4 * 1024 * 1024,
                  seq_tile_budget_bytes: int = 8 * 1024 * 1024,
                  dma_ring: int = 8,
                  force_hbm_gather: bool = False):
    """x: (B, S) int token ids. Returns (B, S, E), matching the PyTorch module."""
    assert dropout == 0.0
    # TODO(synk): training-mode dropout (p > 0) would fuse pltpu.prng_seed /
    # prng_random_bits masking into the epilogue; with p = 0.0 it is identity.

    B, S = x.shape
    V, E = w_tok.shape
    assert w_pos.shape[0] >= S, "seq_len exceeds max_context_len"
    assert w_pos.shape[1] == E

    # PyTorch-style type promotion for (tok + pos).
    out_dtype = jnp.promote_types(w_tok.dtype, w_pos.dtype)
    itemsize = jnp.dtype(out_dtype).itemsize

    # Lane-dense output: pad the embedding dim up to a multiple of 128 so the
    # stores are unmasked vst; the pad is sliced off after the call.
    E_pad = _round_up(E, 128)

    # Clamp ids once on the host side (PyTorch would raise on OOB ids; we
    # clamp like jnp fancy indexing). Keeps the kernel's scalar slot free for
    # DMA address generation.
    ids_flat = jnp.clip(x.reshape(B * S).astype(jnp.int32), 0, V - 1)

    w_tok_p = w_tok.astype(out_dtype)
    w_pos_p = w_pos[:S].astype(out_dtype)      # only rows 0..S-1 are ever used
    if E_pad != E:
        w_tok_p = jnp.pad(w_tok_p, ((0, 0), (0, E_pad - E)))
        w_pos_p = jnp.pad(w_pos_p, ((0, 0), (0, E_pad - E)))

    use_resident = (not force_hbm_gather and
                    V * E_pad * itemsize <= resident_table_budget_bytes)

    # Resident path unrolls the per-row gather -> keep its tile modest.
    max_ts = 128 if use_resident else 1024
    ts = _choose_seq_tile(S, E_pad, itemsize,
                          budget_bytes=seq_tile_budget_bytes, max_ts=max_ts)
    grid = (B, S // ts)

    pos_spec = pl.BlockSpec((ts, E_pad), lambda b, t, ids: (t, 0))
    out_spec = pl.BlockSpec((None, ts, E_pad), lambda b, t, ids: (b, t, 0))
    out_shape = jax.ShapeDtypeStruct((B, S, E_pad), out_dtype)

    cost = pl.CostEstimate(
        flops=B * S * E_pad,                                 # the positional add
        transcendentals=0,
        bytes_accessed=(B * S * 4                            # ids
                        + B * S * E_pad * itemsize           # gathered rows
                        + S * E_pad * itemsize               # positional table
                        + B * S * E_pad * itemsize))         # output

    if use_resident:
        kernel = functools.partial(_embed_resident_kernel, ts=ts)
        grid_spec = pltpu.PrefetchScalarGridSpec(
            num_scalar_prefetch=1,                 # ids -> SMEM
            grid=grid,
            in_specs=[
                # Whole token table resident in VMEM, untiled and
                # single-buffered (grid-invariant -> read from HBM once).
                pl.BlockSpec(memory_space=pltpu.MemorySpace.VMEM),
                pos_spec,
            ],
            out_specs=out_spec,
        )
        vmem_estimate = (V * E_pad * itemsize
                         + 4 * ts * E_pad * itemsize + (2 << 20))
    else:
        ring = max(1, min(dma_ring, ts))
        kernel = functools.partial(_embed_hbm_gather_kernel, ts=ts, ring=ring)
        grid_spec = pltpu.PrefetchScalarGridSpec(
            num_scalar_prefetch=1,                 # ids -> SMEM
            grid=grid,
            in_specs=[
                pl.BlockSpec(memory_space=pl.ANY),   # token table stays in HBM
                pos_spec,
            ],
            out_specs=out_spec,
            scratch_shapes=[pltpu.SemaphoreType.DMA((ring,))],
        )
        vmem_estimate = 4 * ts * E_pad * itemsize + (2 << 20)

    compiler_params = pltpu.CompilerParams(
        # Both grid axes are independent -> shard over both TensorCores.
        dimension_semantics=("parallel", "parallel"),
        # Only raise the scoped VMEM limit when the working set needs it.
        vmem_limit_bytes=(int(vmem_estimate) if vmem_estimate > (32 << 20)
                          else None),
    )

    out = pl.pallas_call(
        kernel,
        out_shape=out_shape,
        grid_spec=grid_spec,
        compiler_params=compiler_params,
        cost_estimate=cost,
    )(ids_flat, w_tok_p, w_pos_p)

    if E_pad != E:
        out = out[..., :E]
    return out


if __name__ == "__main__":
    # Module config (small, consistent with the forward pass):
    vocab_size = 64
    embed_size = 32
    max_context_len = 16
    batch, seq_len = 2, 8

    key = jax.random.PRNGKey(0)
    k_tok, k_pos, k_x = jax.random.split(key, 3)

    # Deterministic "nn.Embedding"-style weights (standard normal init).
    w_tok = jax.random.normal(k_tok, (vocab_size, embed_size), dtype=jnp.float32)
    w_pos = jax.random.normal(k_pos, (max_context_len, embed_size),
                              dtype=jnp.float32)
    x = jax.random.randint(k_x, (batch, seq_len), 0, vocab_size, dtype=jnp.int32)

    # Pure-JAX reference of the gather + positional add semantics.
    ref = w_tok[x] + w_pos[jnp.arange(seq_len)][None, :, :]

    # Path 1: small-vocab fast path (token table resident in VMEM).
    out = jax.block_until_ready(embed_forward(x, w_tok, w_pos, dropout=0.0))
    assert out.shape == (batch, seq_len, embed_size)
    assert jnp.allclose(out, ref, atol=1e-5), "resident-table path mismatch"

    # Path 2: large-vocab path (HBM table, ring-buffered per-row DMA gather),
    # forced at the same small shapes for coverage.
    out2 = jax.block_until_ready(
        embed_forward(x, w_tok, w_pos, dropout=0.0, force_hbm_gather=True))
    assert out2.shape == (batch, seq_len, embed_size)
    assert jnp.allclose(out2, ref, atol=1e-5), "hbm-gather path mismatch"

    print("KERNEL_OK")
</pallas_src>

<mosaic_0001>
module attributes {stable_mosaic.version = 11 : i64} {
  func.func @_embed_resident_kernel(%arg0: i32, %arg1: i32, %arg2: memref<16xi32, #tpu.memory_space<smem>>, %arg3: memref<64x128xf32, #tpu.memory_space<vmem>>, %arg4: memref<8x128xf32, #tpu.memory_space<vmem>>, %arg5: memref<1x8x128xf32, #tpu.memory_space<vmem>>) attributes {dimension_semantics = [#tpu.dimension_semantics<parallel>, #tpu.dimension_semantics<parallel>], iteration_bounds = array<i64: 2, 1>, scalar_prefetch = 1 : i64, scratch_operands = 0 : i64, tpu.core_type = #tpu.core_type<tc>, window_params = [{pipeline_mode = #tpu.pipeline_mode<synchronous>, transform_indices = @transform_0, window_bounds = array<i64: 64, 128>}, {transform_indices = @transform_1, window_bounds = array<i64: 8, 128>}, {transform_indices = @transform_2, window_bounds = array<i64: 1, 8, 128>}]} {
    %c1_i32 = arith.constant 1 : i32
    %0 = arith.muli %arg0, %c1_i32 : i32
    %1 = arith.addi %0, %arg1 : i32
    %c8_i32 = arith.constant 8 : i32
    %2 = arith.muli %1, %c8_i32 : i32
    %c0_i32 = arith.constant 0 : i32
    %3 = arith.addi %2, %c0_i32 : i32
    %4 = arith.index_cast %3 : i32 to index
    %5 = memref.load %arg2[%4] : memref<16xi32, #tpu.memory_space<smem>>
    %6 = arith.index_cast %5 : i32 to index
    %c0 = arith.constant 0 : index
    %7 = vector.load %arg3[%6, %c0] : memref<64x128xf32, #tpu.memory_space<vmem>>, vector<1x128xf32>
    %c1_i32_0 = arith.constant 1 : i32
    %8 = arith.addi %2, %c1_i32_0 : i32
    %9 = arith.index_cast %8 : i32 to index
    %10 = memref.load %arg2[%9] : memref<16xi32, #tpu.memory_space<smem>>
    %11 = arith.index_cast %10 : i32 to index
    %c0_1 = arith.constant 0 : index
    %12 = vector.load %arg3[%11, %c0_1] : memref<64x128xf32, #tpu.memory_space<vmem>>, vector<1x128xf32>
    %c2_i32 = arith.constant 2 : i32
    %13 = arith.addi %2, %c2_i32 : i32
    %14 = arith.index_cast %13 : i32 to index
    %15 = memref.load %arg2[%14] : memref<16xi32, #tpu.memory_space<smem>>
    %16 = arith.index_cast %15 : i32 to index
    %c0_2 = arith.constant 0 : index
    %17 = vector.load %arg3[%16, %c0_2] : memref<64x128xf32, #tpu.memory_space<vmem>>, vector<1x128xf32>
    %c3_i32 = arith.constant 3 : i32
    %18 = arith.addi %2, %c3_i32 : i32
    %19 = arith.index_cast %18 : i32 to index
    %20 = memref.load %arg2[%19] : memref<16xi32, #tpu.memory_space<smem>>
    %21 = arith.index_cast %20 : i32 to index
    %c0_3 = arith.constant 0 : index
    %22 = vector.load %arg3[%21, %c0_3] : memref<64x128xf32, #tpu.memory_space<vmem>>, vector<1x128xf32>
    %c4_i32 = arith.constant 4 : i32
    %23 = arith.addi %2, %c4_i32 : i32
    %24 = arith.index_cast %23 : i32 to index
    %25 = memref.load %arg2[%24] : memref<16xi32, #tpu.memory_space<smem>>
    %26 = arith.index_cast %25 : i32 to index
    %c0_4 = arith.constant 0 : index
    %27 = vector.load %arg3[%26, %c0_4] : memref<64x128xf32, #tpu.memory_space<vmem>>, vector<1x128xf32>
    %c5_i32 = arith.constant 5 : i32
    %28 = arith.addi %2, %c5_i32 : i32
    %29 = arith.index_cast %28 : i32 to index
    %30 = memref.load %arg2[%29] : memref<16xi32, #tpu.memory_space<smem>>
    %31 = arith.index_cast %30 : i32 to index
    %c0_5 = arith.constant 0 : index
    %32 = vector.load %arg3[%31, %c0_5] : memref<64x128xf32, #tpu.memory_space<vmem>>, vector<1x128xf32>
    %c6_i32 = arith.constant 6 : i32
    %33 = arith.addi %2, %c6_i32 : i32
    %34 = arith.index_cast %33 : i32 to index
    %35 = memref.load %arg2[%34] : memref<16xi32, #tpu.memory_space<smem>>
    %36 = arith.index_cast %35 : i32 to index
    %c0_6 = arith.constant 0 : index
    %37 = vector.load %arg3[%36, %c0_6] : memref<64x128xf32, #tpu.memory_space<vmem>>, vector<1x128xf32>
    %c7_i32 = arith.constant 7 : i32
    %38 = arith.addi %2, %c7_i32 : i32
    %39 = arith.index_cast %38 : i32 to index
    %40 = memref.load %arg2[%39] : memref<16xi32, #tpu.memory_space<smem>>
    %41 = arith.index_cast %40 : i32 to index
    %c0_7 = arith.constant 0 : index
    %42 = vector.load %arg3[%41, %c0_7] : memref<64x128xf32, #tpu.memory_space<vmem>>, vector<1x128xf32>
    %43 = tpu.concatenate %7, %12, %17, %22, %27, %32, %37, %42 in 0 : vector<1x128xf32>, vector<1x128xf32>, vector<1x128xf32>, vector<1x128xf32>, vector<1x128xf32>, vector<1x128xf32>, vector<1x128xf32>, vector<1x128xf32> -> vector<8x128xf32>
    %c0_8 = arith.constant 0 : index
    %c0_9 = arith.constant 0 : index
    %44 = vector.load %arg4[%c0_8, %c0_9] : memref<8x128xf32, #tpu.memory_space<vmem>>, vector<8x128xf32>
    %45 = arith.addf %43, %44 : vector<8x128xf32>
    %c0_10 = arith.constant 0 : index
    %c0_11 = arith.constant 0 : index
    %c0_12 = arith.constant 0 : index
    %46 = vector.load %arg5[%c0_10, %c0_11, %c0_12] : memref<1x8x128xf32, #tpu.memory_space<vmem>>, vector<1x8x128xf32>
    %47 = vector.shape_cast %46 : vector<1x8x128xf32> to vector<8x128xf32>
    %48 = vector.shape_cast %45 : vector<8x128xf32> to vector<1x8x128xf32>
    tpu.vector_store %arg5[%c0_10, %c0_11, %c0_12], %48 {strides = array<i32>} : memref<1x8x128xf32, #tpu.memory_space<vmem>>, vector<1x8x128xf32>,
    return
  }
  func.func @transform_0(%arg0: i32, %arg1: i32, %arg2: memref<16xi32, #tpu.memory_space<smem>>) -> (i32, i32) {
    %c0_i32 = arith.constant 0 : i32
    %c0_i32_0 = arith.constant 0 : i32
    %c0_i32_1 = arith.constant 0 : i32
    return %c0_i32, %c0_i32_0 : i32, i32
  }
  func.func @transform_1(%arg0: i32, %arg1: i32, %arg2: memref<16xi32, #tpu.memory_space<smem>>) -> (i32, i32) {
    %c0_i32 = arith.constant 0 : i32
    %c0_i32_0 = arith.constant 0 : i32
    return %arg1, %c0_i32 : i32, i32
  }
  func.func @transform_2(%arg0: i32, %arg1: i32, %arg2: memref<16xi32, #tpu.memory_space<smem>>) -> (i32, i32, i32) {
    %c0_i32 = arith.constant 0 : i32
    %c0_i32_0 = arith.constant 0 : i32
    return %arg0, %arg1, %c0_i32 : i32, i32, i32
  }
}

</mosaic_0001>

<bundles_post_ra>
// kernel: tpu_custom_call.1
= control target key start
LH: loop header
LB: loop body
LE: loop exit
PB: predicated region body
PF: predicated region fallthrough
CT: control target
= control target key end

     0   :  { %s615_s15 = smov [#allocation3]   ;;  %s785_s0 = inlined_call_operand.hbm [shape: s32[16], index: 0, kind: input, shape index: {}]   ;;  %s786_s1 = inlined_call_operand.hbm [shape: f32[64,128], index: 1, kind: input, shape index: {}]   ;;  %s787_s2 = inlined_call_operand.hbm [shape: f32[8,128], index: 2, kind: input, shape index: {}]   ;;  %s788_s3 = inlined_call_operand.hbm [shape: f32[2,8,128], index: 3, kind: output, shape index: {}]  }
   0x1   :  { %s9_s14 = sshll.u32 %s785_s0, 4  ;;  %s10_s14 = int_to_ptr.hbm [resolvable:$true] %s9_s14 }
   0x2   :  { %12 = dma.hbm_to_smem %s10_s14, 16, %s615_s15, [#allocation2] }
   0x3   :  { %577 = dma.done.wait [#allocation2], 16 }
   0x4   :  { %578 = vsyncadd [#allocation2], 4294967280 }
   0x5   :  { %15 = sfence }
   0x6   :  { %16 = vsyncpa [#allocation5], 0 }
   0x7   :  { %17 = vsyncpa [#allocation8], 0 }
   0x8   :  { %18 = vsyncpa [#allocation6], 0 }
   0x9   :  { %20 = vsyncpa [#allocation6 + $0x1], 0  ;;  %s643_s16 = smov 0   ;;  %s645_s17 = smov 0  }
   0xa   :  { %s647_s18 = smov 0   ;;  %s649_s19 = smov 0  }
   0xb   :  { %s651_s20 = smov 0   ;;  %s653_s0 = smov 0  }
   0xc LB: > { %s360_s21 = sadd.s32 4294967295, %s613_s0   ;;  %s361_s22 = sadd.s32 4294967294, %s613_s0   ;;  %s613_s0 = sphi %s653_s0, %s26_s0   ;;  %s609_s20 = sphi %s651_s20, %s797_s20   ;;  %s605_s19 = sphi %s649_s19, %s796_s19   ;;  %s601_s18 = sphi %s647_s18, %s795_s18   ;;  %s597_s17 = sphi %s645_s17, %s794_s17   ;;  %s593_s16 = sphi %s643_s16, %s793_s16  }
   0xd   : > { %s38_s23 = sadd.s32 1, %s609_s20  ;;  %s94_s24 = sadd.s32 1, %s601_s18 }
   0xe   : > { %p40_p0 = scmp.ge.s32.totalorder %s38_s23, 2  ;;  %p104_p1 = scmp.ne.s32.totalorder %s601_s18, %s597_s17 }
   0xf   : > { %p105_p2 = scmp.eq.s32.totalorder %s360_s21, 1  ;;  %p110_p3 = scmp.ne.s32.totalorder %s597_s17, %s593_s16 }
  0x10   : > { %s799_s23 = smov (%p40_p0, %s38_s23), 0  ;;  %p111_p5 = scmp.eq.s32.totalorder %s361_s22, 1 }
  0x11   : > { %p683_p4 = por %p105_p2, %p104_p1  ;;  %s89_s26 = ssub.s32 %s609_s20, %s799_s23 }
  0x12   : > { %p362_p6 = scmp.ge.s32.totalorder %s613_s0, 1  ;;  %p92_p7 = scmp.eq.s32.totalorder %s89_s26, 0 }
  0x13   : > { %p690_p8 = por %p111_p5, %p110_p3  ;;  %p118_p9 = scmp.lt.s32.totalorder %s613_s0, 3 }
  0x14   : > { %s696_s28 = scalar_select %p92_p7, %s601_s18, %s94_s24  }
  0x15   : > { %p698_p10 = pnand %p362_p6, %p118_p9  ;;  %p702_p11 = scmp.eq.s32.totalorder %s360_s21, 0 }
  0x16   : > { %s129_s6 = sshll.u32 %s786_s1, 4  ;;  %s616_s7 = smov [#allocation4]   ;;  %s130_s6 = int_to_ptr.hbm [resolvable:$true] %s129_s6 }
  0x17   : > { %p384_p12 = pneg %p698_p10  ;;  %s131_s8 = sshll.u32 %s616_s7, 4  ;;  %s132_s8 = int_to_ptr.vmem [resolvable:$true] %s131_s8 }
  0x18   : > { %s146_s11 = sshll.u32 %s787_s2, 4  ;;  %s617_s12 = smov 128   ;;  %s147_s11 = int_to_ptr.hbm [resolvable:$true] %s146_s11 }
  0x19   : > { %p385_p13 = pnand %p702_p11, %p384_p12  ;;  %s618_s13 = smov 8  }
  0x1a   : > { %s619_s14 = smov [#allocation7]   ;;  %161 = sbr.rel (%p698_p10) target bundleno = 61 (0x3d), region = 28 }
  0x1b   : > { %387 = dma.hbm_to_vmem [thread:$0]  (!%p385_p13), %s130_s6, 1024, %s132_s8, [#allocation5], %s617_s12, %s617_s12, %s618_s13  }
  0x1c   : > { %s148_s15 = sshll.u32 %s619_s14, 4  ;;  %s149_s15 = int_to_ptr.vmem [resolvable:$true] %s148_s15 }
  0x1d   : > { %390 = dma.hbm_to_vmem [thread:$0]  (!%p385_p13), %s147_s11, 128, %s149_s15, [#allocation8]  }
  0x1f   : > { %580 = dma.done.wait (%p702_p11), [#allocation5], 1024  }
  0x20   : > { %582 = vsyncadd (%p702_p11), [#allocation5], 4294966272 }
  0x21   : > { %584 = dma.done.wait (%p702_p11), [#allocation8], 128  }
  0x22   : > { %586 = vsyncadd (%p702_p11), [#allocation8], 4294967168  ;;  %s727_s21 = sshll.u32 %s605_s19, 3  ;;  %s181_s24 = sand.u32 1, %s597_s17   ;;  %vm238_vm0 = vcmask 1040384   ;;  %vm240_vm1 = vcmask 1041408  }
  0x23   : > { %s186_s22 = sld [smem:[#allocation3 + %s727_s21]]  ;;  %s189_s26 = sadd.s32 1, %s727_s21  ;;  %vm242_vm2 = vcmask 1042432   ;;  %vm244_vm3 = vcmask 1043456   ;;  %vm246_vm4 = vcmask 1044480   ;;  %vm248_vm5 = vcmask 1045504  }
  0x24   : > { %s190_s29 = sld [smem:[#allocation3 + %s189_s26]]  ;;  %s193_s4 = sadd.s32 2, %s727_s21  ;;  %vm250_vm6 = vcmask 1046528   ;;  %v252_v20 = vld [vmem:[#allocation7] sm:$0xff] }
  0x25   : > { %s194_s5 = sld [smem:[#allocation3 + %s193_s4]]  ;;  %s197_s30 = sadd.s32 3, %s727_s21 }
  0x26   : > { %s198_s6 = sld [smem:[#allocation3 + %s197_s30]]  ;;  %s201_s7 = sadd.s32 4, %s727_s21 }
  0x27   : > { %s202_s19 = sld [smem:[#allocation3 + %s201_s7]]  ;;  %s205_s8 = sadd.s32 5, %s727_s21 }
  0x28   : > { %s206_s9 = sld [smem:[#allocation3 + %s205_s8]]  ;;  %s209_s10 = sadd.s32 6, %s727_s21 }
  0x29   : > { %s213_s11 = sadd.s32 7, %s727_s21  ;;  %s738_s12 = sld [smem:[#allocation3 + %s209_s10]] }
  0x2a   : > { %s187_s13 = scalar_lea.vmem [#allocation4], %s186_s22  ;;  %s191_s14 = scalar_lea.vmem [#allocation4], %s190_s29 }
  0x2b   : > { %v188_v0 = vld [vmem:[%s187_s13] sm:$0x1]  ;;  %s214_s15 = sld [smem:[#allocation3 + %s213_s11]]  ;;  %s742_s26 = sshll.u32 %s181_s24, 3 }
  0x2c   : > { %v192_v1 = vld [vmem:[%s191_s14] sm:$0x1]  ;;  %s195_s4 = scalar_lea.vmem [#allocation4], %s194_s5  ;;  %s199_s30 = scalar_lea.vmem [#allocation4], %s198_s6 }
  0x2d   : > { %v196_v2 = vld [vmem:[%s195_s4] sm:$0x1]  ;;  %v218_v3 = vrot.slane %v192_v1, 7  ;;  %s203_s7 = scalar_lea.vmem [#allocation4], %s202_s19  ;;  %s267_s6 = scalar_lea.hbm %s788_s3, %s727_s21 }
  0x2e   : > { %v200_v4 = vld [vmem:[%s199_s30] sm:$0x1]  ;;  %v221_v5 = vrot.slane %v196_v2, 6  ;;  %s207_s22 = scalar_lea.vmem [#allocation4], %s206_s9  ;;  %s183_s9 = scalar_lea.vmem [#allocation9], %s742_s26 }
  0x2f   : > { %v204_v6 = vld [vmem:[%s203_s7] sm:$0x1]  ;;  %v224_v7 = vrot.slane %v200_v4, 5  ;;  %v239_v8 = vsel %vm238_vm0, %v188_v0, %v218_v3  ;;  %s211_s8 = scalar_lea.vmem [#allocation4], %s738_s12  ;;  %s269_s10 = sshll.u32 %s183_s9, 4  ;;  %s270_s10 = int_to_ptr.vmem [resolvable:$true] %s269_s10 }
  0x30   : > { %v208_v9 = vld [vmem:[%s207_s22] sm:$0x1]  ;;  %v227_v10 = vrot.slane %v204_v6, 4  ;;  %v241_v11 = vsel %vm240_vm1, %v239_v8, %v221_v5  ;;  %s271_s11 = sshll.u32 %s267_s6, 4  ;;  %s256_s21 = scalar_lea.sflag [#allocation6], %s181_s24  ;;  %s272_s11 = int_to_ptr.hbm [resolvable:$true] %s271_s11 }
  0x31   : > { %v230_v12 = vrot.slane %v208_v9, 3  ;;  %v243_v13 = vsel %vm242_vm2, %v241_v11, %v224_v7  ;;  %v212_v14 = vld [vmem:[%s211_s8] sm:$0x1]  ;;  %s215_s19 = scalar_lea.vmem [#allocation4], %s214_s15  ;;  %s539_s12 = sshra.s32 %s272_s11, 4  ;;  %s540_s12 = int_to_ptr.hbm [resolvable:$true] %s539_s12 }
  0x32   : > { %v245_v15 = vsel %vm244_vm3, %v243_v13, %v227_v10  ;;  %v216_v16 = vld [vmem:[%s215_s19] sm:$0x1]  ;;  %v233_v17 = vrot.slane %v212_v14, 2  ;;  %s541_s13 = scalar_lea.hbm %s540_s12, 8  ;;  %s545_s26 = scalar_lea.hbm %s788_s3, 16 }
  0x33   : > { %v247_v18 = vsel %vm246_vm4, %v245_v15, %v230_v12  ;;  %v236_v19 = vrot.slane %v216_v16, 1  ;;  %p542_p0 = scmp.ne.s32.totalorder %s540_s12, %s541_s13  ;;  %p546_p3 = scmp.lt.s32.totalorder %s540_s12, %s788_s3 }
  0x34   : > { %v249_v21 = vsel %vm248_vm5, %v247_v18, %v233_v17  ;;  %p547_p5 = scmp.lt.s32.totalorder %s545_s26, %s541_s13 }
  0x35   : > { %v251_v22 = vsel %vm250_vm6, %v249_v21, %v236_v19  ;;  %p543_p1 = pnand %p542_p0, %p683_p4 }
  0x36   : > { %v253_v23 = vadd.f32 %v252_v20, %v251_v22  ;;  %p548_p6 = por %p547_p5, %p546_p3 }
  0x37   : > { %p544_p2 = pneg %p543_p1 }
  0x38   : > { %254 = vst [vmem:[%s183_s9] sm:$0xff] %v253_v23 }
  0x39   : > { %p549_p7 = pnand %p548_p6, %p544_p2 }
  0x3b   : > { %552 = shalt.err (!%p549_p7)
}
  0x3c   : > { %382 = dma.vmem_to_hbm [thread:$0]  (%p683_p4), %s270_s10, 128, %s272_s11, %s256_s21  }
  0x3d PF: > { %p399_p9 = scmp.ge.s32.totalorder %s613_s0, 2  ;;  %s283_s24 = sand.u32 1, %s593_s16  }
  0x3e   : > { %s284_s7 = scalar_lea.sflag [#allocation6], %s283_s24 }
  0x3f   : > { %p392_p10 = pnand %p399_p9, %p690_p8 }
  0x41   : > { %p393_p11 = pneg %p392_p10 }
  0x43   : > { %588 = dma.done.wait (%p393_p11), %s284_s7, 128  }
  0x44   : > { %590 = vsyncadd (%p393_p11), %s284_s7, 4294967168  ;;  %s26_s0 = sadd.s32 1, %s613_s0   ;;  %s793_s16 = smov %s597_s17 }
  0x45   : > { %p23_p12 = scmp.ge.s32.totalorder %s26_s0, 4   ;;  %s794_s17 = smov %s601_s18 }
  0x46   : > { %s795_s18 = smov %s696_s28  ;;  %s796_s19 = smov %s609_s20 }
  0x47   : > { %s797_s20 = smov %s799_s23  ;;  %25 = sbr.rel (!%p23_p12) target bundleno = 12 (0xc), region = 78 }
  0x4c   :  { %290 = vsyncpa [#allocation5], 1 }
  0x4d   :  { %292 = vsyncpa [#allocation5 + $0x1], 1 }
  0x4e   :  { %293 = vsyncpa [#allocation8], 1 }
  0x4f   :  { %294 = vsyncpa [#allocation6], 1 }
  0x50   :  { %296 = vsyncpa [#allocation6 + $0x1], 1 }

</bundles_post_ra>
